<compile_context>
chip_gen: v7x
topology: tpu7x:2x2x1
jax: 0.10.0
libtpu: 0.0.40
codegen_flags: <defaults>
</compile_context>

<pallas_src>
import functools
import math

import jax
import jax.numpy as jnp
from jax.experimental import pallas as pl
from jax.experimental.pallas import tpu as pltpu

_LANE = 128
_SUBLANE = 8


def _round_up(x, m):
    return (x + m - 1) // m * m


def _pack_factor(dim):
    """How many rows of width `dim` pack into one 128-wide lane-dense row."""
    if 0 < dim < _LANE and _LANE % dim == 0:
        return _LANE // dim
    return 1


def _generator_kernel(x_ref, w1_ref, b1_ref, w2_ref, b2_ref, w3_ref, b3_ref,
                      o_ref, *, rows, input_dim, mxu_dtype):
    """One batch tile of the full 3-layer MLP (all operands in VMEM)."""

    def mm(a, w_ref):
        w = w_ref[...]
        if mxu_dtype is not None:            # optional bf16 MXU operands
            a = a.astype(mxu_dtype)
            w = w.astype(mxu_dtype)
        return jnp.dot(a, w, preferred_element_type=jnp.float32)

    x = x_ref[...]
    if x.shape != (rows, input_dim):          # lane-dense packed input block
        x = x.reshape(rows, input_dim)        # lane -> sublane unpack (XLU)

    # Linear 1 + LeakyReLU(0.2)
    h = mm(x, w1_ref) + b1_ref[...]
    h = jnp.maximum(h, 0.2 * h)

    # Linear 2 + LeakyReLU(0.2)
    h = mm(h, w2_ref) + b2_ref[...]
    h = jnp.maximum(h, 0.2 * h)

    # Linear 3 (no activation)
    out = (mm(h, w3_ref) + b3_ref[...]).astype(o_ref.dtype)
    if out.shape != o_ref.shape:              # lane-dense packed output block
        out = out.reshape(o_ref.shape)        # sublane -> lane repack (XLU)
    o_ref[...] = out


def _generator_forward(z, params, *, tile_b, mxu_dtype, pack_io):
    """z: (B, input_dim) float32 -> (B, output_dim) float32."""
    w1, b1, w2, b2, w3, b3 = params  # biases pre-shaped (1, dim)
    B, input_dim = z.shape
    hidden = w1.shape[1]
    out_dim = w3.shape[1]

    # Lane-dense row packing factors (a 16-wide feature packs 8 rows per vreg row).
    pack_in = _pack_factor(input_dim) if pack_io else 1
    pack_out = _pack_factor(out_dim) if pack_io else 1
    row_align = max(pack_in, pack_out)

    # Pad the batch only to the row-pack alignment (<= 7 rows), never to a full
    # tile multiple: the ragged final grid block is handled by Pallas masking.
    b_pad = _round_up(B, row_align)

    # Batch tile: single block for small batches; otherwise <= tile_b rows but
    # at least 2 grid steps so the "parallel" axis can use both v7x TensorCores.
    tile_align = _SUBLANE * max(pack_in, pack_out)
    if b_pad <= min(256, tile_b):
        tb = b_pad
    else:
        n_steps = max(2, pl.cdiv(b_pad, tile_b))
        tb = min(_round_up(pl.cdiv(b_pad, n_steps), tile_align),
                 _round_up(b_pad, tile_align))
    grid = (pl.cdiv(b_pad, tb),)

    z_p = z if b_pad == B else jnp.pad(z, ((0, b_pad - B), (0, 0)))

    # Free row-major reshapes to lane-dense views (no HBM data movement).
    x_in = z_p if pack_in == 1 else z_p.reshape(b_pad // pack_in,
                                                input_dim * pack_in)
    x_block = (tb // pack_in, input_dim * pack_in)
    o_shape = ((b_pad // pack_out, out_dim * pack_out) if pack_out > 1
               else (b_pad, out_dim))
    o_block = (tb // pack_out, out_dim * pack_out)

    const2 = lambda i: (0, 0)   # weights/biases: same block every step (resident)
    row_map = lambda i: (i, 0)

    kernel = functools.partial(_generator_kernel, rows=tb,
                               input_dim=input_dim, mxu_dtype=mxu_dtype)

    out = pl.pallas_call(
        kernel,
        out_shape=jax.ShapeDtypeStruct(o_shape, z.dtype),
        grid=grid,
        in_specs=[
            pl.BlockSpec(x_block, row_map),                  # x tile
            pl.BlockSpec((input_dim, hidden), const2),       # W1 (resident)
            pl.BlockSpec((1, hidden), const2),               # b1
            pl.BlockSpec((hidden, hidden), const2),          # W2
            pl.BlockSpec((1, hidden), const2),               # b2
            pl.BlockSpec((hidden, out_dim), const2),         # W3
            pl.BlockSpec((1, out_dim), const2),              # b3
        ],
        out_specs=pl.BlockSpec(o_block, row_map),
        compiler_params=pltpu.CompilerParams(
            dimension_semantics=("parallel",)),
    )(x_in, w1, b1, w2, b2, w3, b3)

    if pack_out > 1:
        out = out.reshape(b_pad, out_dim)
    return out if b_pad == B else out[:B]


_PACK_IO_OK = None  # lazily probed: can local Mosaic lower the lane repack?


def generator_forward(z, params, *, tile_b=2048, mxu_dtype=None, pack_io=None):
    """Forward pass; tries the lane-dense packed layout, falls back if needed."""
    global _PACK_IO_OK
    if pack_io is None:
        if _PACK_IO_OK is None:
            try:
                out = _generator_forward(z, params, tile_b=tile_b,
                                         mxu_dtype=mxu_dtype, pack_io=True)
                _PACK_IO_OK = True
                return out
            except Exception:
                # Mosaic version without sublane<->lane reshape support:
                # run the (still ragged-grid, resident-weight) plain layout.
                _PACK_IO_OK = False
        pack_io = _PACK_IO_OK
    return _generator_forward(z, params, tile_b=tile_b, mxu_dtype=mxu_dtype,
                              pack_io=pack_io)


def init_params(key, input_dim, output_dim, hidden_dim=128):
    """torch.nn.Linear-style init (U[-1/sqrt(fan_in), 1/sqrt(fan_in)]).

    Biases are stored pre-reshaped to (1, dim) so the forward path does no
    per-call reshapes.
    """
    ks = jax.random.split(key, 6)

    def uniform(k, shape, fan_in):
        bound = 1.0 / math.sqrt(fan_in)
        return jax.random.uniform(k, shape, jnp.float32, -bound, bound)

    w1 = uniform(ks[0], (input_dim, hidden_dim), input_dim)
    b1 = uniform(ks[1], (1, hidden_dim), input_dim)
    w2 = uniform(ks[2], (hidden_dim, hidden_dim), hidden_dim)
    b2 = uniform(ks[3], (1, hidden_dim), hidden_dim)
    w3 = uniform(ks[4], (hidden_dim, output_dim), hidden_dim)
    b3 = uniform(ks[5], (1, output_dim), hidden_dim)
    return (w1, b1, w2, b2, w3, b3)


def reference_forward(z, params):
    """Pure-JAX reference for correctness checking."""
    w1, b1, w2, b2, w3, b3 = params
    h = z @ w1 + b1
    h = jnp.where(h > 0, h, 0.2 * h)
    h = h @ w2 + b2
    h = jnp.where(h > 0, h, 0.2 * h)
    return h @ w3 + b3


if __name__ == "__main__":
    key = jax.random.PRNGKey(0)
    k_p, k_z1, k_z2, k_z3 = jax.random.split(key, 4)

    # Small shapes consistent with the module (embedding-sized latent).
    input_dim, output_dim, hidden_dim = 16, 16, 128
    params = init_params(k_p, input_dim, output_dim, hidden_dim)

    # Case 1: small batch -> single full-batch block, lane-packed in/out.
    z1 = jax.random.normal(k_z1, (8, input_dim), jnp.float32)
    out1 = jax.block_until_ready(generator_forward(z1, params))
    ref1 = reference_forward(z1, params)
    assert out1.shape == (8, output_dim), out1.shape
    assert jnp.allclose(out1, ref1, atol=1e-5, rtol=1e-5), (
        float(jnp.max(jnp.abs(out1 - ref1))))

    # Case 2: batch not a multiple of 8 -> pad-to-8 + final slice path.
    z2 = jax.random.normal(k_z2, (13, input_dim), jnp.float32)
    out2 = jax.block_until_ready(generator_forward(z2, params))
    ref2 = reference_forward(z2, params)
    assert out2.shape == (13, output_dim), out2.shape
    assert jnp.allclose(out2, ref2, atol=1e-5, rtol=1e-5), (
        float(jnp.max(jnp.abs(out2 - ref2))))

    # Case 3: larger batch -> >=2 pipelined grid steps with a ragged last block
    # (no wrapper-side padding of the activations).
    z3 = jax.random.normal(k_z3, (600, input_dim), jnp.float32)
    out3 = jax.block_until_ready(generator_forward(z3, params))
    ref3 = reference_forward(z3, params)
    assert out3.shape == (600, output_dim), out3.shape
    assert jnp.allclose(out3, ref3, atol=1e-5, rtol=1e-5), (
        float(jnp.max(jnp.abs(out3 - ref3))))

    print("KERNEL_OK")
</pallas_src>

<mosaic_0001>
module attributes {stable_mosaic.version = 11 : i64} {
  func.func @_generator_kernel(%arg0: i32, %arg1: memref<1x128xf32, #tpu.memory_space<vmem>>, %arg2: memref<16x128xf32, #tpu.memory_space<vmem>>, %arg3: memref<1x128xf32, #tpu.memory_space<vmem>>, %arg4: memref<128x128xf32, #tpu.memory_space<vmem>>, %arg5: memref<1x128xf32, #tpu.memory_space<vmem>>, %arg6: memref<128x16xf32, #tpu.memory_space<vmem>>, %arg7: memref<1x16xf32, #tpu.memory_space<vmem>>, %arg8: memref<1x128xf32, #tpu.memory_space<vmem>>) attributes {dimension_semantics = [#tpu.dimension_semantics<parallel>], iteration_bounds = array<i64: 1>, scalar_prefetch = 0 : i64, scratch_operands = 0 : i64, tpu.core_type = #tpu.core_type<tc>, window_params = [{transform_indices = @transform_0, window_bounds = array<i64: 1, 128>}, {pipeline_mode = #tpu.pipeline_mode<synchronous>, transform_indices = @transform_1, window_bounds = array<i64: 16, 128>}, {pipeline_mode = #tpu.pipeline_mode<synchronous>, transform_indices = @transform_2, window_bounds = array<i64: 1, 128>}, {pipeline_mode = #tpu.pipeline_mode<synchronous>, transform_indices = @transform_3, window_bounds = array<i64: 128, 128>}, {pipeline_mode = #tpu.pipeline_mode<synchronous>, transform_indices = @transform_4, window_bounds = array<i64: 1, 128>}, {pipeline_mode = #tpu.pipeline_mode<synchronous>, transform_indices = @transform_5, window_bounds = array<i64: 128, 16>}, {pipeline_mode = #tpu.pipeline_mode<synchronous>, transform_indices = @transform_6, window_bounds = array<i64: 1, 16>}, {transform_indices = @transform_7, window_bounds = array<i64: 1, 128>}]} {
    %c0 = arith.constant 0 : index
    %c0_0 = arith.constant 0 : index
    %0 = vector.load %arg1[%c0, %c0_0] : memref<1x128xf32, #tpu.memory_space<vmem>>, vector<1x128xf32>
    %1 = vector.shape_cast %0 : vector<1x128xf32> to vector<8x16xf32>
    %c0_1 = arith.constant 0 : index
    %c0_2 = arith.constant 0 : index
    %2 = vector.load %arg2[%c0_1, %c0_2] : memref<16x128xf32, #tpu.memory_space<vmem>>, vector<16x128xf32>
    %cst = arith.constant dense<0.000000e+00> : vector<8x128xf32>
    %3 = tpu.matmul %1, %2, %cst {dimension_numbers = #tpu.dot_dimension_numbers<[1], [0], [0], [1], [0, 0, 1, 1], [], []>} : vector<8x16xf32>, vector<16x128xf32>, vector<8x128xf32> -> vector<8x128xf32>
    %c0_3 = arith.constant 0 : index
    %c0_4 = arith.constant 0 : index
    %4 = vector.load %arg3[%c0_3, %c0_4] : memref<1x128xf32, #tpu.memory_space<vmem>>, vector<1x128xf32>
    %5 = vector.broadcast %4 : vector<1x128xf32> to vector<8x128xf32>
    %6 = arith.addf %3, %5 : vector<8x128xf32>
    %cst_5 = arith.constant 2.000000e-01 : f32
    %7 = vector.broadcast %cst_5 : f32 to vector<8x128xf32>
    %8 = arith.mulf %7, %6 : vector<8x128xf32>
    %9 = arith.maximumf %6, %8 : vector<8x128xf32>
    %c0_6 = arith.constant 0 : index
    %c0_7 = arith.constant 0 : index
    %10 = vector.load %arg4[%c0_6, %c0_7] : memref<128x128xf32, #tpu.memory_space<vmem>>, vector<128x128xf32>
    %cst_8 = arith.constant dense<0.000000e+00> : vector<8x128xf32>
    %11 = tpu.matmul %9, %10, %cst_8 {dimension_numbers = #tpu.dot_dimension_numbers<[1], [0], [0], [1], [0, 0, 1, 1], [], []>} : vector<8x128xf32>, vector<128x128xf32>, vector<8x128xf32> -> vector<8x128xf32>
    %c0_9 = arith.constant 0 : index
    %c0_10 = arith.constant 0 : index
    %12 = vector.load %arg5[%c0_9, %c0_10] : memref<1x128xf32, #tpu.memory_space<vmem>>, vector<1x128xf32>
    %13 = vector.broadcast %12 : vector<1x128xf32> to vector<8x128xf32>
    %14 = arith.addf %11, %13 : vector<8x128xf32>
    %cst_11 = arith.constant 2.000000e-01 : f32
    %15 = vector.broadcast %cst_11 : f32 to vector<8x128xf32>
    %16 = arith.mulf %15, %14 : vector<8x128xf32>
    %17 = arith.maximumf %14, %16 : vector<8x128xf32>
    %c0_12 = arith.constant 0 : index
    %c0_13 = arith.constant 0 : index
    %18 = vector.load %arg6[%c0_12, %c0_13] : memref<128x16xf32, #tpu.memory_space<vmem>>, vector<128x16xf32>
    %cst_14 = arith.constant dense<0.000000e+00> : vector<8x16xf32>
    %19 = tpu.matmul %17, %18, %cst_14 {dimension_numbers = #tpu.dot_dimension_numbers<[1], [0], [0], [1], [0, 0, 1, 1], [], []>} : vector<8x128xf32>, vector<128x16xf32>, vector<8x16xf32> -> vector<8x16xf32>
    %c0_15 = arith.constant 0 : index
    %c0_16 = arith.constant 0 : index
    %20 = vector.load %arg7[%c0_15, %c0_16] : memref<1x16xf32, #tpu.memory_space<vmem>>, vector<1x16xf32>
    %21 = vector.broadcast %20 : vector<1x16xf32> to vector<8x16xf32>
    %22 = arith.addf %19, %21 : vector<8x16xf32>
    %23 = vector.shape_cast %22 : vector<8x16xf32> to vector<1x128xf32>
    %c0_17 = arith.constant 0 : index
    %c0_18 = arith.constant 0 : index
    %24 = vector.load %arg8[%c0_17, %c0_18] : memref<1x128xf32, #tpu.memory_space<vmem>>, vector<1x128xf32>
    tpu.vector_store %arg8[%c0_17, %c0_18], %23 {strides = array<i32>} : memref<1x128xf32, #tpu.memory_space<vmem>>, vector<1x128xf32>,
    return
  }
  func.func @transform_0(%arg0: i32) -> (i32, i32) {
    %c0_i32 = arith.constant 0 : i32
    %c0_i32_0 = arith.constant 0 : i32
    return %arg0, %c0_i32 : i32, i32
  }
  func.func @transform_1(%arg0: i32) -> (i32, i32) {
    %c0_i32 = arith.constant 0 : i32
    %c0_i32_0 = arith.constant 0 : i32
    %c0_i32_1 = arith.constant 0 : i32
    return %c0_i32, %c0_i32_0 : i32, i32
  }
  func.func @transform_2(%arg0: i32) -> (i32, i32) {
    %c0_i32 = arith.constant 0 : i32
    %c0_i32_0 = arith.constant 0 : i32
    %c0_i32_1 = arith.constant 0 : i32
    return %c0_i32, %c0_i32_0 : i32, i32
  }
  func.func @transform_3(%arg0: i32) -> (i32, i32) {
    %c0_i32 = arith.constant 0 : i32
    %c0_i32_0 = arith.constant 0 : i32
    %c0_i32_1 = arith.constant 0 : i32
    return %c0_i32, %c0_i32_0 : i32, i32
  }
  func.func @transform_4(%arg0: i32) -> (i32, i32) {
    %c0_i32 = arith.constant 0 : i32
    %c0_i32_0 = arith.constant 0 : i32
    %c0_i32_1 = arith.constant 0 : i32
    return %c0_i32, %c0_i32_0 : i32, i32
  }
  func.func @transform_5(%arg0: i32) -> (i32, i32) {
    %c0_i32 = arith.constant 0 : i32
    %c0_i32_0 = arith.constant 0 : i32
    %c0_i32_1 = arith.constant 0 : i32
    return %c0_i32, %c0_i32_0 : i32, i32
  }
  func.func @transform_6(%arg0: i32) -> (i32, i32) {
    %c0_i32 = arith.constant 0 : i32
    %c0_i32_0 = arith.constant 0 : i32
    %c0_i32_1 = arith.constant 0 : i32
    return %c0_i32, %c0_i32_0 : i32, i32
  }
  func.func @transform_7(%arg0: i32) -> (i32, i32) {
    %c0_i32 = arith.constant 0 : i32
    %c0_i32_0 = arith.constant 0 : i32
    return %arg0, %c0_i32 : i32, i32
  }
}

module attributes {stable_mosaic.version = 11 : i64} {
  func.func @_generator_kernel(%arg0: i32, %arg1: memref<8x16xf32, #tpu.memory_space<vmem>>, %arg2: memref<16x128xf32, #tpu.memory_space<vmem>>, %arg3: memref<1x128xf32, #tpu.memory_space<vmem>>, %arg4: memref<128x128xf32, #tpu.memory_space<vmem>>, %arg5: memref<1x128xf32, #tpu.memory_space<vmem>>, %arg6: memref<128x16xf32, #tpu.memory_space<vmem>>, %arg7: memref<1x16xf32, #tpu.memory_space<vmem>>, %arg8: memref<8x16xf32, #tpu.memory_space<vmem>>) attributes {dimension_semantics = [#tpu.dimension_semantics<parallel>], iteration_bounds = array<i64: 1>, scalar_prefetch = 0 : i64, scratch_operands = 0 : i64, tpu.core_type = #tpu.core_type<tc>, window_params = [{transform_indices = @transform_0, window_bounds = array<i64: 8, 16>}, {pipeline_mode = #tpu.pipeline_mode<synchronous>, transform_indices = @transform_1, window_bounds = array<i64: 16, 128>}, {pipeline_mode = #tpu.pipeline_mode<synchronous>, transform_indices = @transform_2, window_bounds = array<i64: 1, 128>}, {pipeline_mode = #tpu.pipeline_mode<synchronous>, transform_indices = @transform_3, window_bounds = array<i64: 128, 128>}, {pipeline_mode = #tpu.pipeline_mode<synchronous>, transform_indices = @transform_4, window_bounds = array<i64: 1, 128>}, {pipeline_mode = #tpu.pipeline_mode<synchronous>, transform_indices = @transform_5, window_bounds = array<i64: 128, 16>}, {pipeline_mode = #tpu.pipeline_mode<synchronous>, transform_indices = @transform_6, window_bounds = array<i64: 1, 16>}, {transform_indices = @transform_7, window_bounds = array<i64: 8, 16>}]} {
    %c0 = arith.constant 0 : index
    %c0_0 = arith.constant 0 : index
    %0 = vector.load %arg1[%c0, %c0_0] : memref<8x16xf32, #tpu.memory_space<vmem>>, vector<8x16xf32>
    %c0_1 = arith.constant 0 : index
    %c0_2 = arith.constant 0 : index
    %1 = vector.load %arg2[%c0_1, %c0_2] : memref<16x128xf32, #tpu.memory_space<vmem>>, vector<16x128xf32>
    %cst = arith.constant dense<0.000000e+00> : vector<8x128xf32>
    %2 = tpu.matmul %0, %1, %cst {dimension_numbers = #tpu.dot_dimension_numbers<[1], [0], [0], [1], [0, 0, 1, 1], [], []>} : vector<8x16xf32>, vector<16x128xf32>, vector<8x128xf32> -> vector<8x128xf32>
    %c0_3 = arith.constant 0 : index
    %c0_4 = arith.constant 0 : index
    %3 = vector.load %arg3[%c0_3, %c0_4] : memref<1x128xf32, #tpu.memory_space<vmem>>, vector<1x128xf32>
    %4 = vector.broadcast %3 : vector<1x128xf32> to vector<8x128xf32>
    %5 = arith.addf %2, %4 : vector<8x128xf32>
    %cst_5 = arith.constant 2.000000e-01 : f32
    %6 = vector.broadcast %cst_5 : f32 to vector<8x128xf32>
    %7 = arith.mulf %6, %5 : vector<8x128xf32>
    %8 = arith.maximumf %5, %7 : vector<8x128xf32>
    %c0_6 = arith.constant 0 : index
    %c0_7 = arith.constant 0 : index
    %9 = vector.load %arg4[%c0_6, %c0_7] : memref<128x128xf32, #tpu.memory_space<vmem>>, vector<128x128xf32>
    %cst_8 = arith.constant dense<0.000000e+00> : vector<8x128xf32>
    %10 = tpu.matmul %8, %9, %cst_8 {dimension_numbers = #tpu.dot_dimension_numbers<[1], [0], [0], [1], [0, 0, 1, 1], [], []>} : vector<8x128xf32>, vector<128x128xf32>, vector<8x128xf32> -> vector<8x128xf32>
    %c0_9 = arith.constant 0 : index
    %c0_10 = arith.constant 0 : index
    %11 = vector.load %arg5[%c0_9, %c0_10] : memref<1x128xf32, #tpu.memory_space<vmem>>, vector<1x128xf32>
    %12 = vector.broadcast %11 : vector<1x128xf32> to vector<8x128xf32>
    %13 = arith.addf %10, %12 : vector<8x128xf32>
    %cst_11 = arith.constant 2.000000e-01 : f32
    %14 = vector.broadcast %cst_11 : f32 to vector<8x128xf32>
    %15 = arith.mulf %14, %13 : vector<8x128xf32>
    %16 = arith.maximumf %13, %15 : vector<8x128xf32>
    %c0_12 = arith.constant 0 : index
    %c0_13 = arith.constant 0 : index
    %17 = vector.load %arg6[%c0_12, %c0_13] : memref<128x16xf32, #tpu.memory_space<vmem>>, vector<128x16xf32>
    %cst_14 = arith.constant dense<0.000000e+00> : vector<8x16xf32>
    %18 = tpu.matmul %16, %17, %cst_14 {dimension_numbers = #tpu.dot_dimension_numbers<[1], [0], [0], [1], [0, 0, 1, 1], [], []>} : vector<8x128xf32>, vector<128x16xf32>, vector<8x16xf32> -> vector<8x16xf32>
    %c0_15 = arith.constant 0 : index
    %c0_16 = arith.constant 0 : index
    %19 = vector.load %arg7[%c0_15, %c0_16] : memref<1x16xf32, #tpu.memory_space<vmem>>, vector<1x16xf32>
    %20 = vector.broadcast %19 : vector<1x16xf32> to vector<8x16xf32>
    %21 = arith.addf %18, %20 : vector<8x16xf32>
    %c0_17 = arith.constant 0 : index
    %c0_18 = arith.constant 0 : index
    %22 = vector.load %arg8[%c0_17, %c0_18] : memref<8x16xf32, #tpu.memory_space<vmem>>, vector<8x16xf32>
    tpu.vector_store %arg8[%c0_17, %c0_18], %21 {strides = array<i32>} : memref<8x16xf32, #tpu.memory_space<vmem>>, vector<8x16xf32>,
    return
  }
  func.func @transform_0(%arg0: i32) -> (i32, i32) {
    %c0_i32 = arith.constant 0 : i32
    %c0_i32_0 = arith.constant 0 : i32
    return %arg0, %c0_i32 : i32, i32
  }
  func.func @transform_1(%arg0: i32) -> (i32, i32) {
    %c0_i32 = arith.constant 0 : i32
    %c0_i32_0 = arith.constant 0 : i32
    %c0_i32_1 = arith.constant 0 : i32
    return %c0_i32, %c0_i32_0 : i32, i32
  }
  func.func @transform_2(%arg0: i32) -> (i32, i32) {
    %c0_i32 = arith.constant 0 : i32
    %c0_i32_0 = arith.constant 0 : i32
    %c0_i32_1 = arith.constant 0 : i32
    return %c0_i32, %c0_i32_0 : i32, i32
  }
  func.func @transform_3(%arg0: i32) -> (i32, i32) {
    %c0_i32 = arith.constant 0 : i32
    %c0_i32_0 = arith.constant 0 : i32
    %c0_i32_1 = arith.constant 0 : i32
    return %c0_i32, %c0_i32_0 : i32, i32
  }
  func.func @transform_4(%arg0: i32) -> (i32, i32) {
    %c0_i32 = arith.constant 0 : i32
    %c0_i32_0 = arith.constant 0 : i32
    %c0_i32_1 = arith.constant 0 : i32
    return %c0_i32, %c0_i32_0 : i32, i32
  }
  func.func @transform_5(%arg0: i32) -> (i32, i32) {
    %c0_i32 = arith.constant 0 : i32
    %c0_i32_0 = arith.constant 0 : i32
    %c0_i32_1 = arith.constant 0 : i32
    return %c0_i32, %c0_i32_0 : i32, i32
  }
  func.func @transform_6(%arg0: i32) -> (i32, i32) {
    %c0_i32 = arith.constant 0 : i32
    %c0_i32_0 = arith.constant 0 : i32
    %c0_i32_1 = arith.constant 0 : i32
    return %c0_i32, %c0_i32_0 : i32, i32
  }
  func.func @transform_7(%arg0: i32) -> (i32, i32) {
    %c0_i32 = arith.constant 0 : i32
    %c0_i32_0 = arith.constant 0 : i32
    return %arg0, %c0_i32 : i32, i32
  }
}

</mosaic_0001>

<bundles_post_ra>
// kernel: tpu_custom_call.1
= control target key start
LH: loop header
LB: loop body
LE: loop exit
PB: predicated region body
PF: predicated region fallthrough
CT: control target
= control target key end

     0   :  { %12 = vsyncpa [#allocation3], 0  ;;  %s753_s0 = inlined_call_operand.hbm [shape: f32[8,16], index: 0, kind: input, shape index: {}]   ;;  %s754_s1 = inlined_call_operand.vmem [shape: f32[16,128], index: 1, kind: input, shape index: {}]   ;;  %s755_s2 = inlined_call_operand.vmem [shape: f32[1,128], index: 2, kind: input, shape index: {}]   ;;  %s756_s3 = inlined_call_operand.vmem [shape: f32[128,128], index: 3, kind: input, shape index: {}]   ;;  %s757_s4 = inlined_call_operand.vmem [shape: f32[1,128], index: 4, kind: input, shape index: {}]   ;;  %s758_s5 = inlined_call_operand.vmem [shape: f32[128,16], index: 5, kind: input, shape index: {}]   ;;  %s759_s6 = inlined_call_operand.vmem [shape: f32[1,16], index: 6, kind: input, shape index: {}]   ;;  %s760_s7 = inlined_call_operand.hbm [shape: f32[8,16], index: 7, kind: output, shape index: {}]  }
   0x1   :  { %13 = vsyncpa [#allocation4], 0  ;;  %s551_s24 = smov [#allocation2]   ;;  %s503_s28 = scalar_lea.hbm %s753_s0, 128 }
   0x2   :  { %s20_s25 = sshll.u32 %s551_s24, 4  ;;  %p504_p0 = scmp.ne.s32.totalorder %s753_s0, %s503_s28  ;;  %s21_s25 = int_to_ptr.vmem [resolvable:$true] %s20_s25 }
   0x3   :  { %p507_p1 = scmp.lt.u32.totalorder %s503_s28, %s753_s0 }
   0x5   :  { %p509_p2 = pnand %p507_p1, %p504_p0 }
   0x7   :  { %512 = shalt.err (!%p509_p2)
}
   0x8   :  { %s513_s10 = scalar_lea.vmem %s21_s25, 128  ;;  %p518_p4 = scmp.lt.s32.totalorder %s21_s25, %s21_s25 }
   0x9   :  { %p514_p3 = scmp.ne.s32.totalorder %s21_s25, %s513_s10  ;;  %p519_p5 = scmp.lt.s32.totalorder %s513_s10, %s513_s10 }
   0xb   :  { %p520_p6 = por %p519_p5, %p518_p4 }
   0xd   :  { %p521_p7 = pnand %p520_p6, %p514_p3 }
   0xf   :  { %524 = shalt.err (!%p521_p7)
}
  0x10   :  { %23 = dma.hbm_to_vmem [thread:$0]  %s753_s0, 128, %s21_s25, [#allocation3]  }
  0x11   :  { %547 = dma.done.wait [#allocation3], 128  }
  0x12   :  { %548 = vsyncadd [#allocation3], 4294967168  ;;  %v552_v0 = vmov 0.0|0.0   ;;  %vm553_vm0 = vmmov 0   ;;  %v554_v1 = vmov 0.0   ;;  %v40_v2 = vld [vmem:[%s754_s1] sm:$0xff] }
  0x13   :  { %447 = vmatprep.subr.bf16.mxu0 %v552_v0  ;;  %374 = vmatprep.mubr.msk.f32.mxu0 %vm553_vm0, %v554_v1  ;;  %v41_v3 = vld [vmem:[%s754_s1 + $0x8] sm:$0xff]  ;;  %v125_v5 = vld [vmem:[%s756_s3] sm:$0xff]  ;;  %v127_v7 = vld [vmem:[%s756_s3 + $0x10] sm:$0xff]  ;;  %vm49_vm1 = vcmask 130048   ;;  %s555_s9 = smov [#allocation5]  }
  0x14   :  { %450 = vmatprep.subr.bf16.mxu1 %v552_v0  ;;  %409 = vmatprep.mubr.msk.f32.mxu1 %vm553_vm0, %v554_v1  ;;  %v448_v4 = vpack.c.bf16 %v41_v3, %v40_v2  ;;  %v126_v6 = vld [vmem:[%s756_s3 + $0x8] sm:$0xff]  ;;  %v128_v9 = vld [vmem:[%s756_s3 + $0x18] sm:$0xff]  ;;  %v39_v10 = vld [vmem:[#allocation2] sm:$0xff]  ;;  %s320_s10 = sshll.u32 %s555_s9, 4  ;;  %s321_s10 = int_to_ptr.vmem [resolvable:$true] %s320_s10 }
  0x15   :  { %v451_v8 = vpack.c.bf16 %v126_v6, %v125_v5  ;;  %v454_v11 = vpack.c.bf16 %v128_v9, %v127_v7  ;;  %v129_v12 = vld [vmem:[%s756_s3 + $0x20] sm:$0xff]  ;;  %v130_v13 = vld [vmem:[%s756_s3 + $0x28] sm:$0xff]  ;;  %v131_v15 = vld [vmem:[%s756_s3 + $0x30] sm:$0xff]  ;;  %p530_p9 = scmp.lt.s32.totalorder %s321_s10, %s321_s10 }
  0x16   :  { %449 = vmatpush3.bf16.msra.mxu0 %v448_v4  ;;  %v457_v14 = vpack.c.bf16 %v130_v13, %v129_v12  ;;  %v132_v16 = vld [vmem:[%s756_s3 + $0x38] sm:$0xff]  ;;  %v133_v18 = vld [vmem:[%s756_s3 + $0x40] sm:$0xff]  ;;  %v134_v19 = vld [vmem:[%s756_s3 + $0x48] sm:$0xff] }
  0x17   :  { %452 = vmatpush3.bf16.msra.mxu1 %v451_v8  ;;  %474 = vmatprep.subr.bf16.mxu0 %v552_v0  ;;  %v460_v17 = vpack.c.bf16 %v132_v16, %v131_v15  ;;  %v463_v20 = vpack.c.bf16 %v134_v19, %v133_v18  ;;  %v135_v21 = vld [vmem:[%s756_s3 + $0x50] sm:$0xff]  ;;  %v136_v22 = vld [vmem:[%s756_s3 + $0x58] sm:$0xff]  ;;  %v137_v24 = vld [vmem:[%s756_s3 + $0x60] sm:$0xff] }
  0x18   :  { %453 = vmatprep.subr.bf16.mxu1 %v552_v0  ;;  %v466_v23 = vpack.c.bf16 %v136_v22, %v135_v21  ;;  %v138_v25 = vld [vmem:[%s756_s3 + $0x68] sm:$0xff]  ;;  %v139_v27 = vld [vmem:[%s756_s3 + $0x70] sm:$0xff]  ;;  %v140_v28 = vld [vmem:[%s756_s3 + $0x78] sm:$0xff] }
  0x19   :  { %375 = vmatmul.mubr.msk.f32.vlgmr.msra.gmra.mrb[0].mxu0 %vm49_vm1, %v39_v10  ;;  %v469_v26 = vpack.c.bf16 %v138_v25, %v137_v24  ;;  %v472_v29 = vpack.c.bf16 %v140_v28, %v139_v27  ;;  %v220_v30 = vld [vmem:[%s758_s5] sm:$0xff]  ;;  %v221_v31 = vld [vmem:[%s758_s5 + $0x8] sm:$0xff]  ;;  %v222_v32 = vld [vmem:[%s758_s5 + $0x10] sm:$0xff] }
  0x1a   :  { %444 = vmatprep.mubr.msk.f32.mxu0 %vm553_vm0, %v554_v1  ;;  %v475_v33 = vpack.c.bf16 %v221_v31, %v220_v30  ;;  %v223_v34 = vld [vmem:[%s758_s5 + $0x18] sm:$0xff]  ;;  %v224_v36 = vld [vmem:[%s758_s5 + $0x20] sm:$0xff]  ;;  %v225_v37 = vld [vmem:[%s758_s5 + $0x28] sm:$0xff] }
  0x1b   :  { %455 = vmatpush3.bf16.msra.mxu1 %v454_v11  ;;  %v478_v35 = vpack.c.bf16 %v223_v34, %v222_v32  ;;  %v481_v38 = vpack.c.bf16 %v225_v37, %v224_v36  ;;  %v226_v39 = vld [vmem:[%s758_s5 + $0x30] sm:$0xff]  ;;  %v227_v40 = vld [vmem:[%s758_s5 + $0x38] sm:$0xff]  ;;  %v228_v42 = vld [vmem:[%s758_s5 + $0x40] sm:$0xff] }
  0x1c   :  { %456 = vmatprep.subr.bf16.mxu1 %v552_v0  ;;  %476 = vmatpush3.bf16.msra.mxu0 %v475_v33  ;;  %v484_v41 = vpack.c.bf16 %v227_v40, %v226_v39  ;;  %v229_v43 = vld [vmem:[%s758_s5 + $0x48] sm:$0xff]  ;;  %v230_v45 = vld [vmem:[%s758_s5 + $0x50] sm:$0xff]  ;;  %v231_v46 = vld [vmem:[%s758_s5 + $0x58] sm:$0xff] }
  0x1d   :  { %477 = vmatprep.subr.bf16.mxu0 %v552_v0  ;;  %v487_v44 = vpack.c.bf16 %v229_v43, %v228_v42  ;;  %v490_v47 = vpack.c.bf16 %v231_v46, %v230_v45  ;;  %v329_v48 = vld [vmem:[%s755_s2] ss:$0 sm:$0xff]  ;;  %v233_v55 = vld [vmem:[%s758_s5 + $0x68] sm:$0xff]  ;;  %v234_v57 = vld [vmem:[%s758_s5 + $0x70] sm:$0xff] }
  0x1e   :  { %v232_v54 = vld [vmem:[%s758_s5 + $0x60] sm:$0xff]  ;;  %v235_v58 = vld [vmem:[%s758_s5 + $0x78] sm:$0xff]  ;;  %s525_s5 = scalar_lea.vmem %s321_s10, 128 }
  0x1f   :  { %458 = vmatpush3.bf16.msra.mxu1 %v457_v14  ;;  %v493_v56 = vpack.c.bf16 %v233_v55, %v232_v54  ;;  %v496_v59 = vpack.c.bf16 %v235_v58, %v234_v57  ;;  %v331_v60 = vld [vmem:[%s757_s4] ss:$0 sm:$0xff]  ;;  %p526_p8 = scmp.ne.s32.totalorder %s321_s10, %s525_s5  ;;  %p531_p10 = scmp.lt.s32.totalorder %s525_s5, %s525_s5 }
  0x20   :  { %459 = vmatprep.subr.bf16.mxu1 %v552_v0  ;;  %479 = vmatpush3.bf16.msra.mxu0 %v478_v35 }
  0x21   :  { %480 = vmatprep.subr.bf16.mxu0 %v552_v0  ;;  %p532_p11 = por %p531_p10, %p530_p9 }
  0x23   :  { %461 = vmatpush3.bf16.msra.mxu1 %v460_v17  ;;  %p533_p12 = pnand %p532_p11, %p526_p8 }
  0x24   :  { %462 = vmatprep.subr.bf16.mxu1 %v552_v0  ;;  %482 = vmatpush3.bf16.msra.mxu0 %v481_v38 }
  0x25   :  { %483 = vmatprep.subr.bf16.mxu0 %v552_v0 }
  0x27   :  { %464 = vmatpush3.bf16.msra.mxu1 %v463_v20 }
  0x28   :  { %465 = vmatprep.subr.bf16.mxu1 %v552_v0  ;;  %485 = vmatpush3.bf16.msra.mxu0 %v484_v41 }
  0x29   :  { %486 = vmatprep.subr.bf16.mxu0 %v552_v0 }
  0x2b   :  { %467 = vmatpush3.bf16.msra.mxu1 %v466_v23 }
  0x2c   :  { %468 = vmatprep.subr.bf16.mxu1 %v552_v0  ;;  %488 = vmatpush3.bf16.msra.mxu0 %v487_v44 }
  0x2d   :  { %489 = vmatprep.subr.bf16.mxu0 %v552_v0 }
  0x2f   :  { %470 = vmatpush3.bf16.msra.mxu1 %v469_v26 }
  0x30   :  { %471 = vmatprep.subr.bf16.mxu1 %v552_v0  ;;  %491 = vmatpush3.bf16.msra.mxu0 %v490_v47 }
  0x31   :  { %492 = vmatprep.subr.bf16.mxu0 %v552_v0 }
  0x33   :  { %473 = vmatpush3.bf16.msra.mxu1 %v472_v29 }
  0x34   :  { %494 = vmatpush3.bf16.msra.mxu0 %v493_v56 }
  0x35   :  { %495 = vmatprep.subr.bf16.mxu0 %v552_v0  ;;  %v332_v0 = vld [vmem:[%s759_s6] ss:$0 sm:$0xff] }
  0x38   :  { %497 = vmatpush3.bf16.msra.mxu0 %v496_v59 }
  0xec   :  { %v119_v49 = vpop.f32.mrb[0].mxu0 }
  0xed   :  { %v120_v50 = vadd.f32 %v329_v48, %v119_v49  ;;  %v376_v51 = vpop.f32.mrb[1].mxu0 }
  0xef   :  { %v123_v52 = vmul.f32 0.2, %v120_v50 }
  0xf1   :  { %v124_v53 = vmax.f32 %v120_v50, %v123_v52 }
  0xf3   :  { %410 = vmatmul.mubr.f32.vlgmr.msra.gmra.mrb[0].mxu1 %v124_v53 }
 0x1c6   :  { %v214_v61 = vpop.f32.mrb[0].mxu1 }
 0x1c7   :  { %v215_v62 = vadd.f32 %v331_v60, %v214_v61  ;;  %v411_v63 = vpop.f32.mrb[1].mxu1 }
 0x1c9   :  { %v218_v1 = vmul.f32 0.2, %v215_v62 }
 0x1cb   :  { %v219_v2 = vmax.f32 %v215_v62, %v218_v1 }
 0x1cd   :  { %445 = vmatmul.mubr.f32.vlgmr.msra.gmra.mrb[2].mxu0 %v219_v2 }
 0x2a0   :  { %v309_v3 = vpop.f32.mrb[2].mxu0 }
 0x2a1   :  { %v310_v4 = vadd.f32 %v332_v0, %v309_v3  ;;  %v446_v5 = vpop.f32.mrb[3].mxu0 }
 0x2a3   :  { %313 = vst.msk [vmem:[#allocation5] sm:$0xff] %vm49_vm1, %v310_v4 }
 0x2a4   :  { %536 = shalt.err (!%p533_p12)
}
 0x2a5   :  { %s537_s12 = scalar_lea.hbm %s760_s7, 128 }
 0x2a6   :  { %p538_p13 = scmp.ne.s32.totalorder %s760_s7, %s537_s12  ;;  %p541_p0 = scmp.lt.u32.totalorder %s537_s12, %s760_s7 }
 0x2a8   :  { %p543_p1 = pnand %p541_p0, %p538_p13 }
 0x2aa   :  { %546 = shalt.err (!%p543_p1)
}
 0x2ab   :  { %323 = dma.vmem_to_hbm [thread:$0]  %s321_s10, 128, %s760_s7, [#allocation4]  }
 0x2ac   :  { %549 = dma.done.wait [#allocation4], 128  }
 0x2ad   :  { %550 = vsyncadd [#allocation4], 4294967168 }
 0x2ae   :  { %327 = vsyncpa [#allocation3], 1 }
 0x2af   :  { %328 = vsyncpa [#allocation4], 1 }

</bundles_post_ra>
